<compile_context>
chip_gen: v7x
topology: tpu7x:2x2x1
jax: 0.10.0
libtpu: 0.0.40
codegen_flags: <defaults>
</compile_context>

<pallas_src>
import jax
import jax.numpy as jnp
from jax import lax
from jax.experimental import pallas as pl
from jax.experimental.pallas import tpu as pltpu


# dot_general dimension numbers (2-D, no batch dims):
#   _NT: contract the LAST dim of lhs with the LAST dim of rhs  (A @ B^T)
#   _TN: contract the FIRST dim of lhs with the FIRST dim of rhs (A^T @ B)
_NT = (((1,), (1,)), ((), ()))
_TN = (((0,), (0,)), ((), ()))


def _mlp_tanh_kernel(x_ref, w1_ref, b1_ref, w2_ref, b2_ref,
                     w3_ref, b3_ref, w4t_ref, b4_ref, o_ref):
    """Fused 4-layer MLP.  Hidden activations are feature-major (batch on the
    128-lane axis, lane-dense); input/output tiles are row-major so no wrapper
    transpose / pad HBM passes are needed.

    x_ref  : (block_b, in_size)   row-major input tile
    wK_ref : (outK, inK)          torch-native nn.Linear weights (layers 1-3)
    bK_ref : (outK, 1)            biases, broadcast along the lane/batch axis
    w4t_ref: (h3, out_size)       layer-4 weight, pre-transposed
    b4_ref : (1, out_size)        layer-4 bias (row vector)
    o_ref  : (block_b, out_size)  row-major output tile
    """
    x = x_ref[...]
    # h1^T = W1 @ x^T  (contract feature axes; MXU handles the orientation --
    # no materialized HBM transpose of x anywhere).
    h = lax.dot_general(w1_ref[...], x, _NT, preferred_element_type=jnp.float32)
    h = jnp.tanh(h + b1_ref[...])                                  # (h1, bb)
    h = jnp.tanh(jnp.dot(w2_ref[...], h,
                         preferred_element_type=jnp.float32) + b2_ref[...])
    h = jnp.tanh(jnp.dot(w3_ref[...], h,
                         preferred_element_type=jnp.float32) + b3_ref[...])
    # y = h^T @ W4^T + b4, produced directly row-major for the store.
    y = lax.dot_general(h, w4t_ref[...], _TN, preferred_element_type=jnp.float32)
    o_ref[...] = (y + b4_ref[...]).astype(o_ref.dtype)


def _round_up(a, m):
    return ((a + m - 1) // m) * m


def _choose_block_b(batch, requested):
    """Pick the batch tile: large (amortize per-step overhead), lane-aligned,
    and with >= 2 grid steps when the batch allows so v7x's two TensorCores
    both get work."""
    bb = max(128, _round_up(requested, 128))
    if batch >= 256:
        bb = min(bb, max(128, _round_up(pl.cdiv(batch, 2), 128)))
    if batch <= bb:
        # Single block covering the whole batch: block dim == full array dim
        # is always a legal block shape, and avoids any masking.
        return batch
    return bb


def _mlp_tanh_jnp(x, p):
    """Pure-jnp reference / tiny-batch fallback (same math as the module)."""
    h = jnp.tanh(x @ p["w1"].T + p["b1"].T)
    h = jnp.tanh(h @ p["w2"].T + p["b2"].T)
    h = jnp.tanh(h @ p["w3"].T + p["b3"].T)
    return h @ p["w4"].T + p["b4"].T


def net_tanh_forward(x, params, *, block_b=4096, min_pallas_batch=0):
    """Forward pass of Net_tanh.

    x      : (B, input_size) f32, row-major (same as torch input).
    params : torch-native layout -- w{k}: (out_k, in_k), b{k}: (out_k, 1).
    Returns (B, output_size) f32.

    min_pallas_batch: batches smaller than this use the fused-XLA fallback
    (for tiny batches launch overhead dominates; set to ~512 in production).
    """
    B, in_size = x.shape
    if B < min_pallas_batch:
        return _mlp_tanh_jnp(x, params)

    w1, b1 = params["w1"], params["b1"]
    w2, b2 = params["w2"], params["b2"]
    w3, b3 = params["w3"], params["b3"]
    w4, b4 = params["w4"], params["b4"]
    out_size = w4.shape[0]

    # Tiny wrapper-side reshapes of the layer-4 params (128 / 8 floats).
    w4t = w4.T                 # (h3, out_size)
    b4_row = b4.T              # (1, out_size)

    bb = _choose_block_b(B, block_b)
    grid = (pl.cdiv(B, bb),)

    def const_spec(shape):
        # Same full block every grid step: DMA'd once, resident across tiles.
        return pl.BlockSpec(shape, lambda i: (0, 0))

    out = pl.pallas_call(
        _mlp_tanh_kernel,
        out_shape=jax.ShapeDtypeStruct((B, out_size), x.dtype),
        grid_spec=pltpu.PrefetchScalarGridSpec(
            num_scalar_prefetch=0,
            grid=grid,
            in_specs=[
                pl.BlockSpec((bb, in_size), lambda i: (i, 0)),   # x tile
                const_spec(w1.shape), const_spec(b1.shape),
                const_spec(w2.shape), const_spec(b2.shape),
                const_spec(w3.shape), const_spec(b3.shape),
                const_spec(w4t.shape), const_spec(b4_row.shape),
            ],
            out_specs=pl.BlockSpec((bb, out_size), lambda i: (i, 0)),
        ),
        compiler_params=pltpu.CompilerParams(
            # Batch tiles are independent -> shard across TensorCores on v7x.
            dimension_semantics=("parallel",),
        ),
    )(x, w1, b1, w2, b2, w3, b3, w4t, b4_row)

    return out


def init_params(key, input_size, h1, h2, h3, output_size, dtype=jnp.float32):
    """Deterministic synthetic init (uniform, like torch Linear default),
    stored in torch-native layout: weights (out, in), biases (out, 1)."""
    dims = [(input_size, h1), (h1, h2), (h2, h3), (h3, output_size)]
    params = {}
    for idx, (fan_in, fan_out) in enumerate(dims, start=1):
        key, kw, kb = jax.random.split(key, 3)
        bound = 1.0 / (fan_in ** 0.5)
        params[f"w{idx}"] = jax.random.uniform(
            kw, (fan_out, fan_in), dtype, minval=-bound, maxval=bound)
        params[f"b{idx}"] = jax.random.uniform(
            kb, (fan_out, 1), dtype, minval=-bound, maxval=bound)
    return params


if __name__ == "__main__":
    key = jax.random.PRNGKey(0)
    # Small shapes implied by the module: batch=8, input=16, h1=h2=h3=32, output=8
    B, input_size, h1, h2, h3, output_size = 8, 16, 32, 32, 32, 8

    key, kx = jax.random.split(key)
    x = jax.random.normal(kx, (B, input_size), jnp.float32)
    params = init_params(key, input_size, h1, h2, h3, output_size)

    # Small batch: single block covering the whole batch.
    y = jax.block_until_ready(net_tanh_forward(x, params))
    y_ref = _mlp_tanh_jnp(x, params)
    assert y.shape == (B, output_size)
    assert jnp.allclose(y, y_ref, atol=1e-4, rtol=1e-4)

    # Ragged multi-block path: 2 grid steps, partial (masked) tail block.
    key, kx2 = jax.random.split(key)
    x2 = jax.random.normal(kx2, (300, input_size), jnp.float32)
    y2 = jax.block_until_ready(net_tanh_forward(x2, params))
    assert jnp.allclose(y2, _mlp_tanh_jnp(x2, params), atol=1e-4, rtol=1e-4)

    print("KERNEL_OK")
</pallas_src>

<mosaic_0001>
module attributes {stable_mosaic.version = 11 : i64} {
  func.func @_mlp_tanh_kernel(%arg0: i32, %arg1: memref<8x16xf32, #tpu.memory_space<vmem>>, %arg2: memref<32x16xf32, #tpu.memory_space<vmem>>, %arg3: memref<32x1xf32, #tpu.memory_space<vmem>>, %arg4: memref<32x32xf32, #tpu.memory_space<vmem>>, %arg5: memref<32x1xf32, #tpu.memory_space<vmem>>, %arg6: memref<32x32xf32, #tpu.memory_space<vmem>>, %arg7: memref<32x1xf32, #tpu.memory_space<vmem>>, %arg8: memref<32x8xf32, #tpu.memory_space<vmem>>, %arg9: memref<1x8xf32, #tpu.memory_space<vmem>>, %arg10: memref<8x8xf32, #tpu.memory_space<vmem>>) attributes {dimension_semantics = [#tpu.dimension_semantics<parallel>], iteration_bounds = array<i64: 1>, scalar_prefetch = 0 : i64, scratch_operands = 0 : i64, tpu.core_type = #tpu.core_type<tc>, window_params = [{transform_indices = @transform_0, window_bounds = array<i64: 8, 16>}, {pipeline_mode = #tpu.pipeline_mode<synchronous>, transform_indices = @transform_1, window_bounds = array<i64: 32, 16>}, {pipeline_mode = #tpu.pipeline_mode<synchronous>, transform_indices = @transform_2, window_bounds = array<i64: 32, 1>}, {pipeline_mode = #tpu.pipeline_mode<synchronous>, transform_indices = @transform_3, window_bounds = array<i64: 32, 32>}, {pipeline_mode = #tpu.pipeline_mode<synchronous>, transform_indices = @transform_4, window_bounds = array<i64: 32, 1>}, {pipeline_mode = #tpu.pipeline_mode<synchronous>, transform_indices = @transform_5, window_bounds = array<i64: 32, 32>}, {pipeline_mode = #tpu.pipeline_mode<synchronous>, transform_indices = @transform_6, window_bounds = array<i64: 32, 1>}, {pipeline_mode = #tpu.pipeline_mode<synchronous>, transform_indices = @transform_7, window_bounds = array<i64: 32, 8>}, {pipeline_mode = #tpu.pipeline_mode<synchronous>, transform_indices = @transform_8, window_bounds = array<i64: 1, 8>}, {transform_indices = @transform_9, window_bounds = array<i64: 8, 8>}]} {
    %c0 = arith.constant 0 : index
    %c0_0 = arith.constant 0 : index
    %0 = vector.load %arg1[%c0, %c0_0] : memref<8x16xf32, #tpu.memory_space<vmem>>, vector<8x16xf32>
    %c0_1 = arith.constant 0 : index
    %c0_2 = arith.constant 0 : index
    %1 = vector.load %arg2[%c0_1, %c0_2] : memref<32x16xf32, #tpu.memory_space<vmem>>, vector<32x16xf32>
    %cst = arith.constant dense<0.000000e+00> : vector<32x8xf32>
    %2 = tpu.matmul %1, %0, %cst {dimension_numbers = #tpu.dot_dimension_numbers<[1], [1], [0], [0], [0, 0, 1, 0], [], []>} : vector<32x16xf32>, vector<8x16xf32>, vector<32x8xf32> -> vector<32x8xf32>
    %c0_3 = arith.constant 0 : index
    %c0_4 = arith.constant 0 : index
    %3 = vector.load %arg3[%c0_3, %c0_4] : memref<32x1xf32, #tpu.memory_space<vmem>>, vector<32x1xf32>
    %4 = vector.broadcast %3 : vector<32x1xf32> to vector<32x8xf32>
    %5 = arith.addf %2, %4 : vector<32x8xf32>
    %6 = math.tanh %5 : vector<32x8xf32>
    %c0_5 = arith.constant 0 : index
    %c0_6 = arith.constant 0 : index
    %7 = vector.load %arg4[%c0_5, %c0_6] : memref<32x32xf32, #tpu.memory_space<vmem>>, vector<32x32xf32>
    %cst_7 = arith.constant dense<0.000000e+00> : vector<32x8xf32>
    %8 = tpu.matmul %7, %6, %cst_7 {dimension_numbers = #tpu.dot_dimension_numbers<[1], [0], [0], [1], [0, 0, 1, 1], [], []>} : vector<32x32xf32>, vector<32x8xf32>, vector<32x8xf32> -> vector<32x8xf32>
    %c0_8 = arith.constant 0 : index
    %c0_9 = arith.constant 0 : index
    %9 = vector.load %arg5[%c0_8, %c0_9] : memref<32x1xf32, #tpu.memory_space<vmem>>, vector<32x1xf32>
    %10 = vector.broadcast %9 : vector<32x1xf32> to vector<32x8xf32>
    %11 = arith.addf %8, %10 : vector<32x8xf32>
    %12 = math.tanh %11 : vector<32x8xf32>
    %c0_10 = arith.constant 0 : index
    %c0_11 = arith.constant 0 : index
    %13 = vector.load %arg6[%c0_10, %c0_11] : memref<32x32xf32, #tpu.memory_space<vmem>>, vector<32x32xf32>
    %cst_12 = arith.constant dense<0.000000e+00> : vector<32x8xf32>
    %14 = tpu.matmul %13, %12, %cst_12 {dimension_numbers = #tpu.dot_dimension_numbers<[1], [0], [0], [1], [0, 0, 1, 1], [], []>} : vector<32x32xf32>, vector<32x8xf32>, vector<32x8xf32> -> vector<32x8xf32>
    %c0_13 = arith.constant 0 : index
    %c0_14 = arith.constant 0 : index
    %15 = vector.load %arg7[%c0_13, %c0_14] : memref<32x1xf32, #tpu.memory_space<vmem>>, vector<32x1xf32>
    %16 = vector.broadcast %15 : vector<32x1xf32> to vector<32x8xf32>
    %17 = arith.addf %14, %16 : vector<32x8xf32>
    %18 = math.tanh %17 : vector<32x8xf32>
    %c0_15 = arith.constant 0 : index
    %c0_16 = arith.constant 0 : index
    %19 = vector.load %arg8[%c0_15, %c0_16] : memref<32x8xf32, #tpu.memory_space<vmem>>, vector<32x8xf32>
    %cst_17 = arith.constant dense<0.000000e+00> : vector<8x8xf32>
    %20 = tpu.matmul %18, %19, %cst_17 {dimension_numbers = #tpu.dot_dimension_numbers<[0], [0], [1], [1], [0, 1, 1, 1], [], []>} : vector<32x8xf32>, vector<32x8xf32>, vector<8x8xf32> -> vector<8x8xf32>
    %c0_18 = arith.constant 0 : index
    %c0_19 = arith.constant 0 : index
    %21 = vector.load %arg9[%c0_18, %c0_19] : memref<1x8xf32, #tpu.memory_space<vmem>>, vector<1x8xf32>
    %22 = vector.broadcast %21 : vector<1x8xf32> to vector<8x8xf32>
    %23 = arith.addf %20, %22 : vector<8x8xf32>
    %c0_20 = arith.constant 0 : index
    %c0_21 = arith.constant 0 : index
    %24 = vector.load %arg10[%c0_20, %c0_21] : memref<8x8xf32, #tpu.memory_space<vmem>>, vector<8x8xf32>
    tpu.vector_store %arg10[%c0_20, %c0_21], %23 {strides = array<i32>} : memref<8x8xf32, #tpu.memory_space<vmem>>, vector<8x8xf32>,
    return
  }
  func.func @transform_0(%arg0: i32) -> (i32, i32) {
    %c0_i32 = arith.constant 0 : i32
    %c0_i32_0 = arith.constant 0 : i32
    return %arg0, %c0_i32 : i32, i32
  }
  func.func @transform_1(%arg0: i32) -> (i32, i32) {
    %c0_i32 = arith.constant 0 : i32
    %c0_i32_0 = arith.constant 0 : i32
    %c0_i32_1 = arith.constant 0 : i32
    return %c0_i32, %c0_i32_0 : i32, i32
  }
  func.func @transform_2(%arg0: i32) -> (i32, i32) {
    %c0_i32 = arith.constant 0 : i32
    %c0_i32_0 = arith.constant 0 : i32
    %c0_i32_1 = arith.constant 0 : i32
    return %c0_i32, %c0_i32_0 : i32, i32
  }
  func.func @transform_3(%arg0: i32) -> (i32, i32) {
    %c0_i32 = arith.constant 0 : i32
    %c0_i32_0 = arith.constant 0 : i32
    %c0_i32_1 = arith.constant 0 : i32
    return %c0_i32, %c0_i32_0 : i32, i32
  }
  func.func @transform_4(%arg0: i32) -> (i32, i32) {
    %c0_i32 = arith.constant 0 : i32
    %c0_i32_0 = arith.constant 0 : i32
    %c0_i32_1 = arith.constant 0 : i32
    return %c0_i32, %c0_i32_0 : i32, i32
  }
  func.func @transform_5(%arg0: i32) -> (i32, i32) {
    %c0_i32 = arith.constant 0 : i32
    %c0_i32_0 = arith.constant 0 : i32
    %c0_i32_1 = arith.constant 0 : i32
    return %c0_i32, %c0_i32_0 : i32, i32
  }
  func.func @transform_6(%arg0: i32) -> (i32, i32) {
    %c0_i32 = arith.constant 0 : i32
    %c0_i32_0 = arith.constant 0 : i32
    %c0_i32_1 = arith.constant 0 : i32
    return %c0_i32, %c0_i32_0 : i32, i32
  }
  func.func @transform_7(%arg0: i32) -> (i32, i32) {
    %c0_i32 = arith.constant 0 : i32
    %c0_i32_0 = arith.constant 0 : i32
    %c0_i32_1 = arith.constant 0 : i32
    return %c0_i32, %c0_i32_0 : i32, i32
  }
  func.func @transform_8(%arg0: i32) -> (i32, i32) {
    %c0_i32 = arith.constant 0 : i32
    %c0_i32_0 = arith.constant 0 : i32
    %c0_i32_1 = arith.constant 0 : i32
    return %c0_i32, %c0_i32_0 : i32, i32
  }
  func.func @transform_9(%arg0: i32) -> (i32, i32) {
    %c0_i32 = arith.constant 0 : i32
    %c0_i32_0 = arith.constant 0 : i32
    return %arg0, %c0_i32 : i32, i32
  }
}

</mosaic_0001>

<bundles_post_ra>
// kernel: tpu_custom_call.1
= control target key start
LH: loop header
LB: loop body
LE: loop exit
PB: predicated region body
PF: predicated region fallthrough
CT: control target
= control target key end

     0   :  { %vm62_vm0 = vcmask 130048   ;;  %v723_v4 = vmov 0   ;;  %s895_s0 = inlined_call_operand.vmem [shape: f32[8,16], index: 0, kind: input, shape index: {}]   ;;  %s896_s1 = inlined_call_operand.vmem [shape: f32[32,16], index: 1, kind: input, shape index: {}]   ;;  %s897_s2 = inlined_call_operand.vmem [shape: f32[32,1], index: 2, kind: input, shape index: {}]   ;;  %s898_s3 = inlined_call_operand.vmem [shape: f32[32,32], index: 3, kind: input, shape index: {}]   ;;  %s899_s4 = inlined_call_operand.vmem [shape: f32[32,1], index: 4, kind: input, shape index: {}]   ;;  %s900_s5 = inlined_call_operand.vmem [shape: f32[32,32], index: 5, kind: input, shape index: {}]   ;;  %s901_s6 = inlined_call_operand.vmem [shape: f32[32,1], index: 6, kind: input, shape index: {}]   ;;  %s902_s7 = inlined_call_operand.vmem [shape: f32[32,8], index: 7, kind: input, shape index: {}]   ;;  %s903_s8 = inlined_call_operand.vmem [shape: f32[1,8], index: 8, kind: input, shape index: {}]   ;;  %s904_s9 = inlined_call_operand.hbm [shape: f32[8,8], index: 9, kind: output, shape index: {}]  }
   0x1   :  { %v33_v0 = vld [vmem:[%s895_s0] sm:$0xff]  ;;  %v35_v3 = vld [vmem:[%s896_s1 + $0x8] sm:$0xff]  ;;  %673 = vset.pattern.permute.xlu0 %v723_v4  ;;  %v40_v5 = vld [vmem:[%s897_s2 + $0x10] sm:$0xff]  ;;  %674 = vset.pattern.permute.xlu1 %v723_v4 }
   0x2   :  { %v34_v1 = vld [vmem:[%s896_s1] sm:$0xff]  ;;  %599 = vmatprep.subr.msk.mxu0 %vm62_vm0, %v33_v0  ;;  %v36_v6 = vld [vmem:[%s896_s1 + $0x10] sm:$0xff]  ;;  %54 = vperm.xlu1 %674, %v40_v5   ;;  %v39_v7 = vld [vmem:[%s897_s2 + $0x8] sm:$0xff] }
   0x3   :  { %601 = vmatprep.mubr.msk.f32.mxu0 %vm62_vm0, %v34_v1  ;;  %v38_v2 = vld [vmem:[%s897_s2] sm:$0xff]  ;;  %600 = vmatpush3.xpose.msk.msra.mxu0 %vm62_vm0, %v33_v0  ;;  %v41_v8 = vld [vmem:[%s897_s2 + $0x18] sm:$0xff] }
   0x4   :  { %44 = vperm.xlu0 %673, %v38_v2  }
   0x6   :  { %602 = vmatmul.mubr.msk.f32.vlgmr.msra.gmra.mrb[0].mxu0 %vm62_vm0, %v35_v3 }
   0x7   :  { %14 = vsyncpa [#allocation3], 0  ;;  %604 = vmatprep.mubr.msk.f32.mxu0 %vm62_vm0, %v36_v6  ;;  %v37_v9 = vld [vmem:[%s896_s1 + $0x18] sm:$0xff]  ;;  %59 = vperm.xlu1 %674, %v41_v8   ;;  %v171_v10 = vld [vmem:[%s899_s4] sm:$0xff]  ;;  %vm195_vm1 = vcmask 261120   ;;  %v724_v1 = vmov 0.0|0.0  }
   0x8   :  { %49 = vperm.xlu0 %673, %v39_v7   ;;  %v172_v11 = vld [vmem:[%s899_s4 + $0x8] sm:$0xff]  ;;  %v173_v12 = vld [vmem:[%s899_s4 + $0x10] sm:$0xff]  ;;  %v174_v13 = vld [vmem:[%s899_s4 + $0x18] sm:$0xff]  ;;  %vm725_vm2 = vmmov 0   ;;  %v726_v4 = vmov 0.0   ;;  %s727_s16 = smov [#allocation2]  }
   0x9   :  { %v301_v14 = vld [vmem:[%s901_s6] sm:$0xff]  ;;  %v302_v15 = vld [vmem:[%s901_s6 + $0x8] sm:$0xff]  ;;  %v303_v16 = vld [vmem:[%s901_s6 + $0x10] sm:$0xff]  ;;  %s550_s0 = sshll.u32 %s727_s16, 4  ;;  %vm542_vm3 = vcmask 64512   ;;  %s551_s0 = int_to_ptr.vmem [resolvable:$true] %s550_s0 }
   0xa   :  { %605 = vmatmul.mubr.msk.f32.gmra.mrb[2].mxu0 %vm62_vm0, %v37_v9  ;;  %v304_v17 = vld [vmem:[%s901_s6 + $0x18] sm:$0xff]  ;;  %v167_v18 = vld [vmem:[%s898_s3] sm:$0xff]  ;;  %v168_v37 = vld [vmem:[%s898_s3 + $0x8] sm:$0xff]  ;;  %s699_s17 = scalar_lea.vmem %s551_s0, 128  ;;  %p704_p1 = scmp.lt.s32.totalorder %s551_s0, %s551_s0 }
   0xb   :  { %182 = vperm.xlu1 %674, %v172_v11   ;;  %615 = vmatprep.mubr.msk.f32.mxu1 %vm195_vm1, %v167_v18  ;;  %v169_v38 = vld [vmem:[%s898_s3 + $0x10] sm:$0xff]  ;;  %v170_v39 = vld [vmem:[%s898_s3 + $0x18] sm:$0xff]  ;;  %v297_v40 = vld [vmem:[%s900_s5] sm:$0xff]  ;;  %p700_p0 = scmp.ne.s32.totalorder %s551_s0, %s699_s17  ;;  %p705_p2 = scmp.lt.s32.totalorder %s699_s17, %s699_s17 }
   0xc   :  { %177 = vperm.xlu0 %673, %v171_v10   ;;  %629 = vmatprep.mubr.msk.f32.mxu0 %vm195_vm1, %v297_v40  ;;  %v298_v59 = vld [vmem:[%s900_s5 + $0x8] sm:$0xff]  ;;  %v299_v60 = vld [vmem:[%s900_s5 + $0x10] sm:$0xff]  ;;  %v300_v61 = vld [vmem:[%s900_s5 + $0x18] sm:$0xff] }
   0xd   :  { %v426_v62 = vld [vmem:[%s902_s7] sm:$0xff]  ;;  %v427_v63 = vld [vmem:[%s902_s7 + $0x8] sm:$0xff]  ;;  %v428_v0 = vld [vmem:[%s902_s7 + $0x10] sm:$0xff]  ;;  %p706_p3 = por %p705_p2, %p704_p1 }
   0xe   :  { %v663_v2 = vpack.c.bf16 %v427_v63, %v426_v62  ;;  %v429_v3 = vld [vmem:[%s902_s7 + $0x18] sm:$0xff] }
   0xf   :  { %192 = vperm.xlu1 %674, %v174_v13   ;;  %v666_v5 = vpack.c.bf16 %v429_v3, %v428_v0  ;;  %p707_p4 = pnand %p706_p3, %p700_p0 }
  0x10   :  { %187 = vperm.xlu0 %673, %v173_v12  }
  0x13   :  { %312 = vperm.xlu1 %674, %v302_v15  }
  0x14   :  { %307 = vperm.xlu0 %673, %v301_v14  }
  0x17   :  { %322 = vperm.xlu1 %674, %v304_v17  }
  0x18   :  { %317 = vperm.xlu0 %673, %v303_v16  }
  0x81   :  { %v55_v20 = vpop.permute.xlu1 %54 }
  0x83   :  { %v45_v19 = vpop.permute.xlu0 %44 }
  0x86   :  { %v60_v26 = vpop.permute.xlu1 %59 }
  0x87   :  { %v50_v21 = vpop.permute.xlu0 %49 }
  0x8a   :  { %v183_v41 = vpop.permute.xlu1 %182 }
  0x8b   :  { %v178_v42 = vpop.permute.xlu0 %177 }
  0x8e   :  { %v193_v47 = vpop.permute.xlu1 %192 }
  0x8f   :  { %v188_v49 = vpop.permute.xlu0 %187 }
  0x92   :  { %v313_v10 = vpop.permute.xlu1 %312 }
  0x93   :  { %v308_v7 = vpop.permute.xlu0 %307 }
  0x96   :  { %v323_v16 = vpop.permute.xlu1 %322 }
  0x97   :  { %v318_v14 = vpop.permute.xlu0 %317 }
  0xd9   :  { %v603_v22 = vpop.f32.mrb[0].mxu0 }
  0xda   :  { %v150_v23 = vadd.f32 %v603_v22, %v50_v21  ;;  %v144_v24 = vpop.f32.mrb[1].mxu0 }
  0xdb   :  { %v145_v25 = vadd.f32 %v144_v24, %v45_v19 }
  0xdc   :  { %675 = vtanh.f32 %v150_v23  ;;  %v571_v23 = vld [vmem:[%s903_s8] ss:$0 sm:$0xff] }
  0xdd   :  { %677 = vtanh.f32 %v145_v25  ;;  %v606_v27 = vpop.f32.mrb[2].mxu0 }
  0xde   :  { %v160_v28 = vadd.f32 %v606_v27, %v60_v26  ;;  %v154_v29 = vpop.f32.mrb[3].mxu0 }
  0xdf   :  { %v155_v30 = vadd.f32 %v154_v29, %v55_v20 }
  0xe0   :  { %679 = vtanh.f32 %v160_v28 }
  0xe1   :  { %681 = vtanh.f32 %v155_v30 }
  0xe6   :  { %v676_v31 = vpop.eup %675 }
  0xe7   :  { %v678_v32 = vpop.eup %677 }
  0xe8   :  { %v646_v33 = vpack.c.bf16 %v676_v31, %v678_v32 }
  0xea   :  { %v680_v34 = vpop.eup %679  ;;  %647 = vmatprep.subr.bf16.mxu1 %v646_v33 }
  0xeb   :  { %v682_v35 = vpop.eup %681  ;;  %649 = vmatpush3.bf16.msra.mxu1 %v646_v33 }
  0xec   :  { %v650_v36 = vpack.c.bf16 %v680_v34, %v682_v35 }
  0xee   :  { %651 = vmatprep.subr.bf16.mxu1 %v650_v36 }
  0xef   :  { %653 = vmatpush3.bf16.msra.mxu1 %v650_v36 }
  0xf0   :  { %662 = vmatprep.subr.bf16.mxu1 %v724_v1 }
  0xf2   :  { %616 = vmatmul.mubr.msk.f32.vlgmr.msra.gmra.mrb[0].mxu1 %vm195_vm1, %v168_v37 }
  0xf3   :  { %618 = vmatprep.mubr.msk.f32.mxu1 %vm195_vm1, %v169_v38  ;;  %664 = vmatpush3.bf16.msra.mxu1 %v663_v2 }
  0xf4   :  { %665 = vmatprep.subr.bf16.mxu1 %v724_v1 }
  0xf6   :  { %619 = vmatmul.mubr.msk.f32.gmra.mrb[2].mxu1 %vm195_vm1, %v170_v39 }
  0xf7   :  { %643 = vmatprep.mubr.msk.f32.mxu1 %vm725_vm2, %v726_v4  ;;  %667 = vmatpush3.bf16.msra.mxu1 %v666_v5 }
 0x1c5   :  { %v617_v43 = vpop.f32.mrb[0].mxu1 }
 0x1c6   :  { %v280_v44 = vadd.f32 %v617_v43, %v183_v41  ;;  %v274_v45 = vpop.f32.mrb[1].mxu1 }
 0x1c7   :  { %v275_v46 = vadd.f32 %v274_v45, %v178_v42 }
 0x1c8   :  { %683 = vtanh.f32 %v280_v44 }
 0x1c9   :  { %685 = vtanh.f32 %v275_v46  ;;  %v620_v48 = vpop.f32.mrb[2].mxu1 }
 0x1ca   :  { %v290_v50 = vadd.f32 %v620_v48, %v193_v47  ;;  %v284_v51 = vpop.f32.mrb[3].mxu1 }
 0x1cb   :  { %v285_v52 = vadd.f32 %v284_v51, %v188_v49 }
 0x1cc   :  { %687 = vtanh.f32 %v290_v50 }
 0x1cd   :  { %689 = vtanh.f32 %v285_v52 }
 0x1d2   :  { %v684_v53 = vpop.eup %683 }
 0x1d3   :  { %v686_v54 = vpop.eup %685 }
 0x1d4   :  { %v654_v55 = vpack.c.bf16 %v684_v53, %v686_v54 }
 0x1d6   :  { %v688_v56 = vpop.eup %687  ;;  %655 = vmatprep.subr.bf16.mxu0 %v654_v55 }
 0x1d7   :  { %v690_v57 = vpop.eup %689  ;;  %657 = vmatpush3.bf16.msra.mxu0 %v654_v55 }
 0x1d8   :  { %v658_v58 = vpack.c.bf16 %v688_v56, %v690_v57 }
 0x1da   :  { %659 = vmatprep.subr.bf16.mxu0 %v658_v58 }
 0x1db   :  { %661 = vmatpush3.bf16.msra.mxu0 %v658_v58 }
 0x1de   :  { %630 = vmatmul.mubr.msk.f32.vlgmr.msra.gmra.mrb[4].mxu0 %vm195_vm1, %v298_v59 }
 0x1df   :  { %632 = vmatprep.mubr.msk.f32.mxu0 %vm195_vm1, %v299_v60 }
 0x1e2   :  { %633 = vmatmul.mubr.msk.f32.gmra.mrb[6].mxu0 %vm195_vm1, %v300_v61 }
 0x2b1   :  { %v631_v6 = vpop.f32.mrb[4].mxu0 }
 0x2b2   :  { %v403_v8 = vpop.f32.mrb[5].mxu0  ;;  %v409_v11 = vadd.f32 %v631_v6, %v313_v10 }
 0x2b3   :  { %v404_v9 = vadd.f32 %v403_v8, %v308_v7 }
 0x2b5   :  { %691 = vtanh.f32 %v404_v9  ;;  %v634_v12 = vpop.f32.mrb[6].mxu0 }
 0x2b6   :  { %v413_v13 = vpop.f32.mrb[7].mxu0  ;;  %693 = vtanh.f32 %v409_v11  ;;  %v419_v17 = vadd.f32 %v634_v12, %v323_v16 }
 0x2b7   :  { %v414_v15 = vadd.f32 %v413_v13, %v318_v14 }
 0x2b9   :  { %695 = vtanh.f32 %v414_v15 }
 0x2ba   :  { %697 = vtanh.f32 %v419_v17 }
 0x2bf   :  { %v692_v18 = vpop.eup %691 }
 0x2c0   :  { %437 = vxpose.xlu0.b32.start [1/4] (short) (narrow) %v692_v18, 8  ;;  %v694_v19 = vpop.eup %693 }
 0x2c3   :  { %v696_v20 = vpop.eup %695 }
 0x2c4   :  { %438 = vxpose.xlu0.b32.cont [2/4] (short) (narrow) %v694_v19, 8  ;;  %v698_v21 = vpop.eup %697 }
 0x2c8   :  { %439 = vxpose.xlu0.b32.cont [3/4] (short) (narrow) %v696_v20, 8 }
 0x2cc   :  { %440 = vxpose.xlu0.b32.end [4/4] (short) (narrow) %v698_v21, 8 }
 0x340   :  { %v453_v22 = vpop.trf.xlu0 }
 0x341   :  { %644 = vmatmul.mubr.msk.f32.vlgmr.msra.gmra.mrb[4].mxu1 %vm195_vm1, %v453_v22 }
 0x414   :  { %v538_v24 = vpop.f32.mrb[4].mxu1 }
 0x415   :  { %v539_v25 = vadd.f32 %v571_v23, %v538_v24  ;;  %v645_v26 = vpop.f32.mrb[5].mxu1 }
 0x417   :  { %543 = vst.msk [vmem:[#allocation2] sm:$0xff] %vm542_vm3, %v539_v25 }
 0x418   :  { %710 = shalt.err (!%p707_p4)
}
 0x419   :  { %s711_s6 = scalar_lea.hbm %s904_s9, 128 }
 0x41a   :  { %p712_p5 = scmp.ne.s32.totalorder %s904_s9, %s711_s6  ;;  %p715_p6 = scmp.lt.u32.totalorder %s711_s6, %s904_s9 }
 0x41c   :  { %p717_p7 = pnand %p715_p6, %p712_p5 }
 0x41e   :  { %720 = shalt.err (!%p717_p7)
}
 0x41f   :  { %553 = dma.vmem_to_hbm [thread:$0]  %s551_s0, 128, %s904_s9, [#allocation3]  }
 0x420   :  { %721 = dma.done.wait [#allocation3], 128  }
 0x421   :  { %722 = vsyncadd [#allocation3], 4294967168 }
 0x422   :  { %557 = vsyncpa [#allocation3], 1 }

</bundles_post_ra>
